<compile_context>
chip_gen: v7x
topology: tpu7x:2x2x1
jax: 0.10.0
libtpu: 0.0.40
codegen_flags: <defaults>
</compile_context>

<pallas_src>
import functools
import math

import jax
import jax.numpy as jnp
from jax import lax
from jax.experimental import pallas as pl
from jax.experimental.pallas import tpu as pltpu


# ----------------------------------------------------------------------------
# Fused kernel: visual encoder (both images) + CLIP logits head.
#   patches : (2B, P, K)   bf16, tiled over the patch axis (reduction grid)
#   w_conv  : (K, width)   bf16, resident
#   w_proj  : (width, D)   bf16, resident
#   scale   : (1, 1)       f32  logit_scale (resident)
#   l1, l2  : (B, B)       f32  logits_per_img1 / logits_per_img2
#   acc_ref : (2B, K)      f32  VMEM scratch (per-image patch sums)
# ----------------------------------------------------------------------------
def _fused_clip_kernel(patches_ref, wconv_ref, wproj_ref, scale_ref,
                       l1_ref, l2_ref, acc_ref, *, num_patches, batch):
    step = pl.program_id(0)

    @pl.when(step == 0)
    def _():
        acc_ref[...] = jnp.zeros_like(acc_ref)

    # (2B, tp, K) bf16 tile -> accumulate per-image patch sums in f32.
    # Pooling commutes with the per-patch linear maps, so pool-first is exact.
    acc_ref[...] += jnp.sum(patches_ref[...].astype(jnp.float32), axis=1)

    @pl.when(step == pl.num_programs(0) - 1)
    def _():
        # --- encoder tail: pooled patches -> conv1 weight -> projection ---
        pooled = (acc_ref[...] * (1.0 / num_patches)).astype(jnp.bfloat16)
        h = jnp.dot(pooled, wconv_ref[...],
                    preferred_element_type=jnp.float32)           # (2B, width)
        feat = jnp.dot(h.astype(jnp.bfloat16), wproj_ref[...],
                       preferred_element_type=jnp.float32)        # (2B, D) f32

        # --- CLIP head (entirely in VMEM, no HBM round-trip of features) ---
        f1 = feat[:batch]                                         # (B, D)
        f2 = feat[batch:]                                         # (B, D)
        # L2 normalize via rsqrt (EUP slot); no epsilon -- matches x/x.norm().
        n1 = f1 * lax.rsqrt(jnp.sum(f1 * f1, axis=1, keepdims=True))
        n2 = f2 * lax.rsqrt(jnp.sum(f2 * f2, axis=1, keepdims=True))
        # Fold exp(logit_scale) into n1: B*D multiplies instead of B*B.
        n1s = n1 * jnp.exp(scale_ref[...])                        # (1,1) bcast
        contract_last = (((1,), (1,)), ((), ()))   # "a @ b.T" w/o a transpose
        l1_ref[...] = lax.dot_general(
            n1s, n2, contract_last,
            preferred_element_type=jnp.float32).astype(l1_ref.dtype)
        # logits2 = logits1.T, produced as a second MXU matmul (no XLU xpose).
        l2_ref[...] = lax.dot_general(
            n2, n1s, contract_last,
            preferred_element_type=jnp.float32).astype(l2_ref.dtype)


def _choose_patch_tile(num_patches, max_tile=512):
    """Largest patch tile dividing P; multiple of 8 unless it is the whole axis."""
    if num_patches <= max_tile:
        return num_patches
    for t in range(max_tile, 0, -1):
        if num_patches % t == 0 and t % 8 == 0:
            return t
    return num_patches


def clip_forward_pallas(patches, w_conv, w_proj, logit_scale, batch):
    b2, num_p, k = patches.shape
    width = w_conv.shape[1]
    embed_dim = w_proj.shape[1]
    tp = _choose_patch_tile(num_p)
    grid = (num_p // tp,)

    scale_2d = jnp.reshape(logit_scale, (1, 1)).astype(jnp.float32)

    flops = (2 * b2 * num_p * k              # pooling adds
             + 2 * b2 * k * width            # pooled @ w_conv
             + 2 * b2 * width * embed_dim    # h @ w_proj
             + 4 * batch * batch * embed_dim  # two (B,D)@(D,B) logit matmuls
             + 8 * batch * embed_dim)        # normalization / scaling
    bytes_accessed = (patches.size * patches.dtype.itemsize
                      + w_conv.size * w_conv.dtype.itemsize
                      + w_proj.size * w_proj.dtype.itemsize
                      + 4                    # logit_scale
                      + 2 * batch * batch * 4)

    kernel = functools.partial(_fused_clip_kernel,
                               num_patches=num_p, batch=batch)
    return pl.pallas_call(
        kernel,
        out_shape=(jax.ShapeDtypeStruct((batch, batch), jnp.float32),
                   jax.ShapeDtypeStruct((batch, batch), jnp.float32)),
        grid_spec=pltpu.PrefetchScalarGridSpec(
            num_scalar_prefetch=0,
            grid=grid,
            in_specs=[
                pl.BlockSpec((b2, tp, k), lambda i: (0, i, 0)),      # patches
                pl.BlockSpec((k, width), lambda i: (0, 0)),          # resident
                pl.BlockSpec((width, embed_dim), lambda i: (0, 0)),  # resident
                pl.BlockSpec((1, 1), lambda i: (0, 0)),              # scale
            ],
            out_specs=[
                pl.BlockSpec((batch, batch), lambda i: (0, 0)),
                pl.BlockSpec((batch, batch), lambda i: (0, 0)),
            ],
            scratch_shapes=[pltpu.VMEM((b2, k), jnp.float32)],
        ),
        # Patch axis is a reduction accumulated into the scratch -> arbitrary.
        compiler_params=pltpu.CompilerParams(
            dimension_semantics=("arbitrary",)),
        cost_estimate=pl.CostEstimate(
            flops=flops, transcendentals=2 * batch + 1,
            bytes_accessed=bytes_accessed),
    )(patches, w_conv, w_proj, scale_2d)


# ----------------------------------------------------------------------------
# Glue: patch extraction (plain JAX layout op) + full CLIPComplete forward
# ----------------------------------------------------------------------------
def extract_patches(img_nchw, patch):
    # img: (B, C, H, W) -> (B, num_patches, C * patch * patch)
    b, c, h, w = img_nchw.shape
    gh, gw = h // patch, w // patch
    x = img_nchw.reshape(b, c, gh, patch, gw, patch)
    x = jnp.transpose(x, (0, 2, 4, 1, 3, 5))          # (B, gh, gw, C, p, p)
    return x.reshape(b, gh * gw, c * patch * patch)


def clip_complete_forward(params, img1, img2, patch):
    b = img1.shape[0]
    p1 = extract_patches(img1, patch)
    p2 = extract_patches(img2, patch)
    # v1/v2 are deep copies of the same module -> identical weights, so both
    # images run through a single fused pallas_call (bf16 in, f32 accumulate).
    patches = jnp.concatenate([p1, p2], axis=0).astype(jnp.bfloat16)  # (2B,P,K)
    return clip_forward_pallas(patches,
                               params["w_conv"].astype(jnp.bfloat16),
                               params["w_proj"].astype(jnp.bfloat16),
                               params["logit_scale"],
                               batch=b)


clip_complete_forward_jit = jax.jit(clip_complete_forward,
                                    static_argnames=("patch",))


def clip_complete_reference(params, img1, img2, patch):
    """Pure-JAX f32 reference (same math: conv1 patch-embed, mean pool, proj)."""
    def encode(img):
        p = extract_patches(img, patch)               # (B, P, K)
        pooled = jnp.mean(p, axis=1)                  # pool-first == pool-last
        return pooled @ params["w_conv"] @ params["w_proj"]
    f1, f2 = encode(img1), encode(img2)
    n1 = f1 / jnp.linalg.norm(f1, axis=1, keepdims=True)
    n2 = f2 / jnp.linalg.norm(f2, axis=1, keepdims=True)
    scale = jnp.exp(params["logit_scale"][0])
    l1 = scale * n1 @ n2.T
    return l1, l1.T


def make_params(key, in_channels, patch, width, embed_dim):
    k1, k2 = jax.random.split(key)
    kdim = in_channels * patch * patch
    # conv1 weight (out=width, in=C, kh=p, kw=p) -> flattened to (K, width)
    conv_w = jax.random.normal(k1, (width, in_channels, patch, patch),
                               dtype=jnp.float32) * (1.0 / math.sqrt(kdim))
    conv_mat = conv_w.reshape(width, kdim).T                 # (K, width)
    proj = jax.random.normal(k2, (width, embed_dim),
                             dtype=jnp.float32) * (1.0 / math.sqrt(width))
    return {
        "w_conv": conv_mat,
        "w_proj": proj,
        "logit_scale": jnp.array([math.log(1.0 / 0.07)], dtype=jnp.float32),
    }


if __name__ == "__main__":
    key = jax.random.PRNGKey(0)
    kp, ki1, ki2 = jax.random.split(key, 3)

    batch, channels, spatial = 2, 3, 16
    patch, width, embed_dim = 8, 128, 128   # lane-dense (128-aligned) N dims

    params = make_params(kp, channels, patch, width, embed_dim)
    img1 = jax.random.normal(ki1, (batch, channels, spatial, spatial),
                             dtype=jnp.float32)
    img2 = jax.random.normal(ki2, (batch, channels, spatial, spatial),
                             dtype=jnp.float32)

    logits_per_img1, logits_per_img2 = clip_complete_forward_jit(
        params, img1, img2, patch=patch)
    jax.block_until_ready((logits_per_img1, logits_per_img2))

    # sanity: logits_per_img2 must be the transpose of logits_per_img1
    assert logits_per_img1.shape == (batch, batch)
    assert jnp.allclose(logits_per_img1.T, logits_per_img2, atol=1e-5)

    # pure-JAX reference check (loose tolerance: bf16 inputs, f32 accumulate)
    ref1, ref2 = clip_complete_reference(params, img1, img2, patch)
    assert jnp.allclose(logits_per_img1, ref1, rtol=3e-2, atol=0.25)
    assert jnp.allclose(logits_per_img2, ref2, rtol=3e-2, atol=0.25)

    print("KERNEL_OK")
</pallas_src>

<mosaic_0001>
module attributes {stable_mosaic.version = 11 : i64} {
  func.func @_fused_clip_kernel(%arg0: i32, %arg1: memref<4x4x192xbf16, #tpu.memory_space<vmem>>, %arg2: memref<192x128xbf16, #tpu.memory_space<vmem>>, %arg3: memref<128x128xbf16, #tpu.memory_space<vmem>>, %arg4: memref<1x1xf32, #tpu.memory_space<vmem>>, %arg5: memref<2x2xf32, #tpu.memory_space<vmem>>, %arg6: memref<2x2xf32, #tpu.memory_space<vmem>>, %arg7: memref<4x192xf32, #tpu.memory_space<vmem>>) attributes {dimension_semantics = [#tpu.dimension_semantics<arbitrary>], iteration_bounds = array<i64: 1>, scalar_prefetch = 0 : i64, scratch_operands = 1 : i64, tpu.core_type = #tpu.core_type<tc>, window_params = [{transform_indices = @transform_0, window_bounds = array<i64: 4, 4, 192>}, {pipeline_mode = #tpu.pipeline_mode<synchronous>, transform_indices = @transform_1, window_bounds = array<i64: 192, 128>}, {pipeline_mode = #tpu.pipeline_mode<synchronous>, transform_indices = @transform_2, window_bounds = array<i64: 128, 128>}, {pipeline_mode = #tpu.pipeline_mode<synchronous>, transform_indices = @transform_3, window_bounds = array<i64: 1, 1>}, {pipeline_mode = #tpu.pipeline_mode<synchronous>, transform_indices = @transform_4, window_bounds = array<i64: 2, 2>}, {pipeline_mode = #tpu.pipeline_mode<synchronous>, transform_indices = @transform_5, window_bounds = array<i64: 2, 2>}]} {
    %c0_i32 = arith.constant 0 : i32
    %0 = arith.cmpi eq, %arg0, %c0_i32 : i32
    %1 = arith.extui %0 : i1 to i32
    %c0_i32_0 = arith.constant 0 : i32
    %2 = arith.cmpi ne, %1, %c0_i32_0 : i32
    scf.if %2 {
      %cst_9 = arith.constant 0.000000e+00 : f32
      %12 = vector.broadcast %cst_9 : f32 to vector<4x192xf32>
      %c0_10 = arith.constant 0 : index
      %c0_11 = arith.constant 0 : index
      %13 = vector.load %arg7[%c0_10, %c0_11] : memref<4x192xf32, #tpu.memory_space<vmem>>, vector<4x192xf32>
      tpu.vector_store %arg7[%c0_10, %c0_11], %12 {strides = array<i32>} : memref<4x192xf32, #tpu.memory_space<vmem>>, vector<4x192xf32>,
    } else {
    }
    %c0 = arith.constant 0 : index
    %c0_1 = arith.constant 0 : index
    %3 = vector.load %arg7[%c0, %c0_1] : memref<4x192xf32, #tpu.memory_space<vmem>>, vector<4x192xf32>
    %c0_2 = arith.constant 0 : index
    %c0_3 = arith.constant 0 : index
    %c0_4 = arith.constant 0 : index
    %4 = vector.load %arg1[%c0_2, %c0_3, %c0_4] : memref<4x4x192xbf16, #tpu.memory_space<vmem>>, vector<4x4x192xbf16>
    %5 = arith.extf %4 : vector<4x4x192xbf16> to vector<4x4x192xf32>
    %cst = arith.constant dense<0.000000e+00> : vector<4x192xf32>
    %6 = vector.multi_reduction <add>, %5, %cst [1] : vector<4x4x192xf32> to vector<4x192xf32>
    %7 = arith.addf %3, %6 : vector<4x192xf32>
    %c0_5 = arith.constant 0 : index
    %c0_6 = arith.constant 0 : index
    %8 = vector.load %arg7[%c0_5, %c0_6] : memref<4x192xf32, #tpu.memory_space<vmem>>, vector<4x192xf32>
    tpu.vector_store %arg7[%c0_5, %c0_6], %7 {strides = array<i32>} : memref<4x192xf32, #tpu.memory_space<vmem>>, vector<4x192xf32>,
    %c0_i32_7 = arith.constant 0 : i32
    %9 = arith.cmpi eq, %arg0, %c0_i32_7 : i32
    %10 = arith.extui %9 : i1 to i32
    %c0_i32_8 = arith.constant 0 : i32
    %11 = arith.cmpi ne, %10, %c0_i32_8 : i32
    scf.if %11 {
      %c0_9 = arith.constant 0 : index
      %c0_10 = arith.constant 0 : index
      %12 = vector.load %arg7[%c0_9, %c0_10] : memref<4x192xf32, #tpu.memory_space<vmem>>, vector<4x192xf32>
      %cst_11 = arith.constant 2.500000e-01 : f32
      %13 = vector.broadcast %cst_11 : f32 to vector<4x192xf32>
      %14 = arith.mulf %12, %13 : vector<4x192xf32>
      %15 = arith.truncf %14 : vector<4x192xf32> to vector<4x192xbf16>
      %c0_12 = arith.constant 0 : index
      %c0_13 = arith.constant 0 : index
      %16 = vector.load %arg2[%c0_12, %c0_13] : memref<192x128xbf16, #tpu.memory_space<vmem>>, vector<192x128xbf16>
      %cst_14 = arith.constant dense<0.000000e+00> : vector<4x128xf32>
      %17 = tpu.matmul %15, %16, %cst_14 {dimension_numbers = #tpu.dot_dimension_numbers<[1], [0], [0], [1], [0, 0, 1, 1], [], []>} : vector<4x192xbf16>, vector<192x128xbf16>, vector<4x128xf32> -> vector<4x128xf32>
      %18 = arith.truncf %17 : vector<4x128xf32> to vector<4x128xbf16>
      %c0_15 = arith.constant 0 : index
      %c0_16 = arith.constant 0 : index
      %19 = vector.load %arg3[%c0_15, %c0_16] : memref<128x128xbf16, #tpu.memory_space<vmem>>, vector<128x128xbf16>
      %cst_17 = arith.constant dense<0.000000e+00> : vector<4x128xf32>
      %20 = tpu.matmul %18, %19, %cst_17 {dimension_numbers = #tpu.dot_dimension_numbers<[1], [0], [0], [1], [0, 0, 1, 1], [], []>} : vector<4x128xbf16>, vector<128x128xbf16>, vector<4x128xf32> -> vector<4x128xf32>
      %21 = vector.extract_strided_slice %20 {offsets = [0, 0], sizes = [2, 128], strides = [1, 1]} : vector<4x128xf32> to vector<2x128xf32>
      %22 = vector.extract_strided_slice %20 {offsets = [2, 0], sizes = [2, 128], strides = [1, 1]} : vector<4x128xf32> to vector<2x128xf32>
      %23 = arith.mulf %21, %21 : vector<2x128xf32>
      %cst_18 = arith.constant dense<0.000000e+00> : vector<2xf32>
      %24 = vector.multi_reduction <add>, %23, %cst_18 [1] : vector<2x128xf32> to vector<2xf32>
      %25 = vector.shape_cast %24 : vector<2xf32> to vector<2x1xf32>
      %26 = math.rsqrt %25 : vector<2x1xf32>
      %27 = vector.broadcast %26 : vector<2x1xf32> to vector<2x128xf32>
      %28 = arith.mulf %21, %27 : vector<2x128xf32>
      %29 = arith.mulf %22, %22 : vector<2x128xf32>
      %cst_19 = arith.constant dense<0.000000e+00> : vector<2xf32>
      %30 = vector.multi_reduction <add>, %29, %cst_19 [1] : vector<2x128xf32> to vector<2xf32>
      %31 = vector.shape_cast %30 : vector<2xf32> to vector<2x1xf32>
      %32 = math.rsqrt %31 : vector<2x1xf32>
      %33 = vector.broadcast %32 : vector<2x1xf32> to vector<2x128xf32>
      %34 = arith.mulf %22, %33 : vector<2x128xf32>
      %c0_20 = arith.constant 0 : index
      %c0_21 = arith.constant 0 : index
      %35 = vector.load %arg4[%c0_20, %c0_21] : memref<1x1xf32, #tpu.memory_space<vmem>>, vector<1x1xf32>
      %36 = math.exp %35 : vector<1x1xf32>
      %37 = vector.broadcast %36 : vector<1x1xf32> to vector<2x128xf32>
      %38 = arith.mulf %28, %37 : vector<2x128xf32>
      %cst_22 = arith.constant dense<0.000000e+00> : vector<2x2xf32>
      %39 = tpu.matmul %38, %34, %cst_22 {dimension_numbers = #tpu.dot_dimension_numbers<[1], [1], [0], [0], [0, 0, 1, 0], [], []>} : vector<2x128xf32>, vector<2x128xf32>, vector<2x2xf32> -> vector<2x2xf32>
      %c0_23 = arith.constant 0 : index
      %c0_24 = arith.constant 0 : index
      %40 = vector.load %arg5[%c0_23, %c0_24] : memref<2x2xf32, #tpu.memory_space<vmem>>, vector<2x2xf32>
      tpu.vector_store %arg5[%c0_23, %c0_24], %39 {strides = array<i32>} : memref<2x2xf32, #tpu.memory_space<vmem>>, vector<2x2xf32>,
      %cst_25 = arith.constant dense<0.000000e+00> : vector<2x2xf32>
      %41 = tpu.matmul %34, %38, %cst_25 {dimension_numbers = #tpu.dot_dimension_numbers<[1], [1], [0], [0], [0, 0, 1, 0], [], []>} : vector<2x128xf32>, vector<2x128xf32>, vector<2x2xf32> -> vector<2x2xf32>
      %c0_26 = arith.constant 0 : index
      %c0_27 = arith.constant 0 : index
      %42 = vector.load %arg6[%c0_26, %c0_27] : memref<2x2xf32, #tpu.memory_space<vmem>>, vector<2x2xf32>
      tpu.vector_store %arg6[%c0_26, %c0_27], %41 {strides = array<i32>} : memref<2x2xf32, #tpu.memory_space<vmem>>, vector<2x2xf32>,
    } else {
    }
    return
  }
  func.func @transform_0(%arg0: i32) -> (i32, i32, i32) {
    %c0_i32 = arith.constant 0 : i32
    %c0_i32_0 = arith.constant 0 : i32
    %c0_i32_1 = arith.constant 0 : i32
    return %c0_i32, %arg0, %c0_i32_0 : i32, i32, i32
  }
  func.func @transform_1(%arg0: i32) -> (i32, i32) {
    %c0_i32 = arith.constant 0 : i32
    %c0_i32_0 = arith.constant 0 : i32
    %c0_i32_1 = arith.constant 0 : i32
    return %c0_i32, %c0_i32_0 : i32, i32
  }
  func.func @transform_2(%arg0: i32) -> (i32, i32) {
    %c0_i32 = arith.constant 0 : i32
    %c0_i32_0 = arith.constant 0 : i32
    %c0_i32_1 = arith.constant 0 : i32
    return %c0_i32, %c0_i32_0 : i32, i32
  }
  func.func @transform_3(%arg0: i32) -> (i32, i32) {
    %c0_i32 = arith.constant 0 : i32
    %c0_i32_0 = arith.constant 0 : i32
    %c0_i32_1 = arith.constant 0 : i32
    return %c0_i32, %c0_i32_0 : i32, i32
  }
  func.func @transform_4(%arg0: i32) -> (i32, i32) {
    %c0_i32 = arith.constant 0 : i32
    %c0_i32_0 = arith.constant 0 : i32
    %c0_i32_1 = arith.constant 0 : i32
    return %c0_i32, %c0_i32_0 : i32, i32
  }
  func.func @transform_5(%arg0: i32) -> (i32, i32) {
    %c0_i32 = arith.constant 0 : i32
    %c0_i32_0 = arith.constant 0 : i32
    %c0_i32_1 = arith.constant 0 : i32
    return %c0_i32, %c0_i32_0 : i32, i32
  }
}

</mosaic_0001>

<bundles_post_ra>
// kernel: clip_complete_forward.1
= control target key start
LH: loop header
LB: loop body
LE: loop exit
PB: predicated region body
PF: predicated region fallthrough
CT: control target
= control target key end

     0   :  { %s930_s0 = inlined_call_operand.vmem [shape: bf16[4,4,192], index: 0, kind: input, shape index: {}]   ;;  %s931_s1 = inlined_call_operand.vmem [shape: bf16[192,128], index: 1, kind: input, shape index: {}]   ;;  %s932_s2 = inlined_call_operand.vmem [shape: bf16[128,128], index: 2, kind: input, shape index: {}]   ;;  %s933_s3 = inlined_call_operand.<no memory space> [shape: f32[1,1], index: 3, kind: input, shape index: {}]   ;;  %s934_s4 = inlined_call_operand.hbm [shape: f32[2,2], index: 4, kind: output, shape index: {0}]   ;;  %s935_s5 = inlined_call_operand.hbm [shape: f32[2,2], index: 5, kind: output, shape index: {1}]  }
   0x1   :  { %v11_v0 = vstv %s933_s3 }
   0x2   :  { %12 = vst [vmem:[#allocation3] sm:$0x1] %v11_v0 }
   0x3   :  { %13 = vsyncpa [#allocation5], 0  ;;  %v678_v1 = vld [vmem:[%s931_s1] sm:$0xff]   ;;  %v752_v2 = vmov 0   ;;  %v679_v3 = vld [vmem:[%s931_s1 + $0x8] sm:$0xff]   ;;  %v753_v4 = vmov 0.0  }
   0x4   :  { %253 = vmatprep.subr.bf16.mxu0 %v752_v2  ;;  %676 = vset.pattern.permute.xlu1 %v752_v2  ;;  %v680_v5 = vld [vmem:[%s931_s1 + $0x10] sm:$0xff]   ;;  %vm29_vm0 = vcmask 523268   ;;  %v681_v6 = vld [vmem:[%s931_s1 + $0x18] sm:$0xff]   ;;  %vm28_vm1 = vcmask 1043456   ;;  %v620_v8 = vld [vmem:[%s930_s0] sm:$0xff]   ;;  %vm61_vm3 = vcmask 519168  }
   0x5   :  { %254 = vmatpush1.bf16.msra.mxu0 %v678_v1  ;;  %677 = vset.pattern.permute.xlu0 %v752_v2  ;;  %vm810_vm2 = vmor %vm29_vm0, %vm28_vm1  ;;  %v627_v9 = vld [vmem:[%s930_s0 + $0x8] sm:$0xff]   ;;  %v621_v10 = vunpack.c.l.bf16 %v620_v8  ;;  %v622_v11 = vunpack.c.h.bf16 %v620_v8  ;;  %v690_v14 = vld [vmem:[%s932_s2] sm:$0xff]  }
   0x6   :  { %255 = vmatprep.subr.bf16.mxu0 %v752_v2  ;;  %641 = vmatprep.subr.bf16.mxu1 %v753_v4  ;;  %31 = vst.msk [vmem:[#allocation2] sm:$0xff] %vm810_vm2, %v753_v4  ;;  %v625_v12 = vunpack.c.l.bf16 %v627_v9  ;;  %v626_v13 = vunpack.c.h.bf16 %v627_v9  ;;  %v682_v15 = vld [vmem:[%s931_s1 + $0x20] sm:$0xff]   ;;  %v691_v20 = vld [vmem:[%s932_s2 + $0x8] sm:$0xff]   ;;  %v692_v42 = vld [vmem:[%s932_s2 + $0x10] sm:$0xff]  }
   0x7   :  { %v45_v16 = vcombine.high %v621_v10, %v621_v10  ;;  %v46_v17 = vcombine.high %v622_v11, %v622_v11  ;;  %v54_v21 = vsel %vm28_vm1, %v621_v10, 0.0  ;;  %v69_v22 = vsel %vm28_vm1, %v622_v11, 0.0  ;;  %642 = vmatpush3.bf16.msra.mxu1 %v690_v14  ;;  %v683_v29 = vld [vmem:[%s931_s1 + $0x28] sm:$0xff]   ;;  %v684_v43 = vld [vmem:[%s931_s1 + $0x30] sm:$0xff]   ;;  %v693_v60 = vld [vmem:[%s932_s2 + $0x18] sm:$0xff]  }
   0x8   :  { %v47_v18 = vcombine.high %v625_v12, %v625_v12  ;;  %v48_v19 = vcombine.high %v626_v13, %v626_v13  ;;  %v83_v23 = vsel %vm28_vm1, %v625_v12, 0.0  ;;  %v97_v24 = vsel %vm28_vm1, %v626_v13, 0.0  ;;  %643 = vmatprep.subr.bf16.mxu1 %v753_v4 }
   0x9   :  { %256 = vmatpush1.bf16.msra.mxu0 %v679_v3  ;;  %v55_v25 = vrot.slane %v54_v21, 4  ;;  %v62_v26 = vsel %vm61_vm3, %v45_v16, 0.0  ;;  %v70_v27 = vrot.slane %v69_v22, 4  ;;  %v76_v28 = vsel %vm61_vm3, %v46_v17, 0.0 }
   0xa   :  { %257 = vmatprep.subr.bf16.mxu0 %v752_v2  ;;  %v63_v30 = vrot.slane %v62_v26, 4  ;;  %v77_v31 = vrot.slane %v76_v28, 4  ;;  %v84_v32 = vrot.slane %v83_v23, 4  ;;  %v90_v33 = vsel %vm61_vm3, %v47_v18, 0.0 }
   0xb   :  { %v56_v34 = vadd.f32 %v55_v25, %v54_v21  ;;  %v71_v35 = vadd.f32 %v70_v27, %v69_v22  ;;  %v91_v36 = vrot.slane %v90_v33, 4  ;;  %v98_v37 = vrot.slane %v97_v24, 4  ;;  %644 = vmatpush3.bf16.msra.mxu1 %v691_v20 }
   0xc   :  { %v64_v38 = vadd.f32 %v63_v30, %v62_v26  ;;  %v78_v39 = vadd.f32 %v77_v31, %v76_v28  ;;  %v85_v40 = vadd.f32 %v84_v32, %v83_v23  ;;  %v104_v41 = vsel %vm61_vm3, %v48_v19, 0.0  ;;  %645 = vmatprep.subr.bf16.mxu1 %v753_v4 }
   0xd   :  { %258 = vmatpush1.bf16.msra.mxu0 %v680_v5  ;;  %v57_v44 = vrot.slane %v56_v34, 2  ;;  %v72_v45 = vrot.slane %v71_v35, 2  ;;  %v92_v46 = vadd.f32 %v91_v36, %v90_v33  ;;  %v99_v47 = vadd.f32 %v98_v37, %v97_v24 }
   0xe   :  { %259 = vmatprep.subr.bf16.mxu0 %v752_v2  ;;  %v65_v48 = vrot.slane %v64_v38, 2  ;;  %v79_v49 = vrot.slane %v78_v39, 2  ;;  %v86_v50 = vrot.slane %v85_v40, 2  ;;  %v105_v51 = vrot.slane %v104_v41, 4 }
   0xf   :  { %v58_v52 = vadd.f32 %v57_v44, %v56_v34  ;;  %v73_v53 = vadd.f32 %v72_v45, %v71_v35  ;;  %v93_v54 = vrot.slane %v92_v46, 2  ;;  %v100_v55 = vrot.slane %v99_v47, 2  ;;  %646 = vmatpush3.bf16.msra.mxu1 %v692_v42 }
  0x10   :  { %v66_v56 = vadd.f32 %v65_v48, %v64_v38  ;;  %v80_v57 = vadd.f32 %v79_v49, %v78_v39  ;;  %v87_v58 = vadd.f32 %v86_v50, %v85_v40  ;;  %v106_v59 = vadd.f32 %v105_v51, %v104_v41 }
  0x11   :  { %260 = vmatpush1.bf16.msra.mxu0 %v681_v6 }
  0x12   :  { %261 = vmatprep.subr.bf16.mxu0 %v752_v2 }
  0x15   :  { %262 = vmatpush1.bf16.msra.mxu0 %v682_v15 }
  0x16   :  { %263 = vmatprep.subr.bf16.mxu0 %v752_v2 }
  0x19   :  { %264 = vmatpush1.bf16.msra.mxu0 %v683_v29 }
  0x1a   :  { %265 = vmatprep.subr.bf16.mxu0 %v752_v2 }
  0x1b   :  { %14 = vsyncpa [#allocation7], 0  ;;  %v59_v61 = vrot.slane %v58_v52, 1  ;;  %v74_v62 = vrot.slane %v73_v53, 1  ;;  %v94_v63 = vadd.f32 %v93_v54, %v92_v46  ;;  %v101_v0 = vadd.f32 %v100_v55, %v99_v47  ;;  %647 = vmatprep.subr.bf16.mxu1 %v753_v4  ;;  %v685_v1 = vld [vmem:[%s931_s1 + $0x38] sm:$0xff]   ;;  %v694_v17 = vld [vmem:[%s932_s2 + $0x20] sm:$0xff]  }
  0x1c   :  { %v67_v3 = vrot.slane %v66_v56, 1  ;;  %v81_v5 = vrot.slane %v80_v57, 1  ;;  %v88_v6 = vrot.slane %v87_v58, 1  ;;  %v107_v8 = vrot.slane %v106_v59, 2  ;;  %648 = vmatpush3.bf16.msra.mxu1 %v693_v60  ;;  %v686_v19 = vld [vmem:[%s931_s1 + $0x40] sm:$0xff]   ;;  %v695_v27 = vld [vmem:[%s932_s2 + $0x28] sm:$0xff]  }
  0x1d   :  { %266 = vmatpush1.bf16.msra.mxu0 %v684_v43  ;;  %v60_v9 = vadd.f32 %v59_v61, %v58_v52  ;;  %v75_v10 = vadd.f32 %v74_v62, %v73_v53  ;;  %v95_v11 = vrot.slane %v94_v63, 1  ;;  %v102_v12 = vrot.slane %v101_v0, 1  ;;  %649 = vmatprep.subr.bf16.mxu1 %v753_v4  ;;  %v687_v29 = vld [vmem:[%s931_s1 + $0x48] sm:$0xff]   ;;  %v696_v35 = vld [vmem:[%s932_s2 + $0x30] sm:$0xff]   ;;  %v32_v36 = vld [vmem:[#allocation2] sm:$0xff]  ;;  %s756_s10 = smov [#allocation6]  }
  0x1e   :  { %267 = vmatprep.subr.bf16.mxu0 %v752_v2  ;;  %v68_v13 = vadd.f32 %v67_v3, %v66_v56  ;;  %v82_v14 = vadd.f32 %v81_v5, %v80_v57  ;;  %v89_v15 = vadd.f32 %v88_v6, %v87_v58  ;;  %v108_v16 = vadd.f32 %v107_v8, %v106_v59  ;;  %v688_v38 = vld [vmem:[%s931_s1 + $0x50] sm:$0xff]   ;;  %v689_v42 = vld [vmem:[%s931_s1 + $0x58] sm:$0xff]   ;;  %v411_v52 = vld [vmem:[#allocation3] sm:$0x1]  ;;  %s755_s1 = smov [#allocation4]   ;;  %s586_s11 = sshll.u32 %s756_s10, 4  ;;  %s587_s11 = int_to_ptr.vmem [resolvable:$true] %s586_s11 }
  0x1f   :  { %v96_v18 = vadd.f32 %v95_v11, %v94_v63  ;;  %v103_v20 = vadd.f32 %v102_v12, %v101_v0  ;;  %vm124_vm4 = vcmask 1041409   ;;  %vm126_vm5 = vcmask 1045509   ;;  %v697_v48 = vld [vmem:[%s932_s2 + $0x38] sm:$0xff]   ;;  %s576_s2 = sshll.u32 %s755_s1, 4  ;;  %s577_s2 = int_to_ptr.vmem [resolvable:$true] %s576_s2 }
  0x20   :  { %v109_v21 = vrot.slane %v108_v16, 1  ;;  %v119_v22 = vcombine.low %v60_v9, %v68_v13  ;;  %v120_v23 = vcombine.low %v75_v10, %v82_v14  ;;  %650 = vmatpush3.bf16.msra.mxu1 %v694_v17  ;;  %vm129_vm6 = vcmask 1042434   ;;  %s704_s12 = scalar_lea.vmem %s577_s2, 32  ;;  %p709_p1 = scmp.lt.s32.totalorder %s577_s2, %s577_s2 }
  0x21   :  { %268 = vmatpush1.bf16.msra.mxu0 %v685_v1  ;;  %v121_v24 = vcombine.low %v89_v15, %v96_v18  ;;  %651 = vmatprep.subr.bf16.mxu1 %v753_v4  ;;  %vm131_vm7 = vcmask 1046534   ;;  %vm134_vm8 = vcmask 1043459   ;;  %vm136_vm9 = vcmask 1047559   ;;  %p705_p0 = scmp.ne.s32.totalorder %s577_s2, %s704_s12  ;;  %p710_p2 = scmp.lt.s32.totalorder %s704_s12, %s704_s12 }
  0x22   :  { %269 = vmatprep.subr.bf16.mxu0 %v752_v2  ;;  %v110_v25 = vadd.f32 %v109_v21, %v108_v16  ;;  %v123_v26 = vrot.slane %v120_v23, 7  ;;  %vm249_vm10 = vcmask 523264   ;;  %vm754_vm11 = vmmov 0  }
  0x23   :  { %v128_v28 = vrot.slane %v121_v24, 6  ;;  %657 = vmatprep.mubr.msk.bf16.mxu1 %vm754_vm11, %v753_v4  ;;  %v412_v53 = vmul.f32 1.442695, %v411_v52  ;;  %v415_v54 = vlaneseq  ;;  %vm405_vm12 = vcmask 1043458   ;;  %p711_p3 = por %p710_p2, %p709_p1 }
  0x24   :  { %v122_v30 = vcombine.low %v103_v20, %v110_v25  ;;  %v125_v31 = vsel %vm124_vm4, %v123_v26, %v119_v22  ;;  %652 = vmatpush3.bf16.msra.mxu1 %v695_v27  ;;  %vm399_vm13 = vcmask 1041408   ;;  %vm497_vm14 = vcmask 9216  }
  0x25   :  { %270 = vmatpush1.bf16.msra.mxu0 %v686_v19  ;;  %v127_v32 = vsel %vm126_vm5, %v123_v26, %v125_v31  ;;  %653 = vmatprep.subr.bf16.mxu1 %v753_v4  ;;  %698 = vpow2.f32 %v412_v53  ;;  %v416_v55 = vshrl.u32 %v415_v54, 7  ;;  %p712_p4 = pnand %p711_p3, %p705_p0 }
  0x26   :  { %271 = vmatprep.subr.bf16.mxu0 %v752_v2  ;;  %v130_v33 = vsel %vm129_vm6, %v128_v28, %v127_v32  ;;  %v133_v34 = vrot.slane %v122_v30, 5 }
  0x27   :  { %v132_v37 = vsel %vm131_vm7, %v128_v28, %v130_v33  ;;  %v417_v56 = vsub.s32 0, %v416_v55 }
  0x28   :  { %v135_v39 = vsel %vm134_vm8, %v133_v34, %v132_v37  ;;  %654 = vmatpush3.bf16.msra.mxu1 %v696_v35 }
  0x29   :  { %272 = vmatpush1.bf16.msra.mxu0 %v687_v29  ;;  %v137_v40 = vsel %vm136_vm9, %v133_v34, %v135_v39  ;;  %655 = vmatprep.subr.bf16.mxu1 %v753_v4 }
  0x2a   :  { %273 = vmatprep.subr.bf16.mxu0 %v752_v2  ;;  %v139_v41 = vadd.f32 %v137_v40, %v32_v36 }
  0x2c   :  { %142 = vst.msk [vmem:[#allocation2] sm:$0xff] %vm810_vm2, %v139_v41  ;;  %656 = vmatpush3.bf16.msra.mxu1 %v697_v48 }
  0x2d   :  { %274 = vmatpush1.bf16.msra.mxu0 %v688_v38  ;;  %661 = vmatprep.subr.mxu1 %v753_v4 }
  0x2e   :  { %275 = vmatprep.subr.bf16.mxu0 %v752_v2 }
  0x2f   :  { %v699_v57 = vpop.eup %698 }
  0x30   :  { %v418_v58 = vrot.slane %v699_v57, %v417_v56 }
  0x31   :  { %276 = vmatpush1.bf16.msra.mxu0 %v689_v42 }
  0x32   :  { %420 = vperm.xlu1 %676, %v418_v58  }
  0x33   :  { %v146_v43 = vld [vmem:[#allocation2] sm:$0xff] }
  0x34   :  { %v147_v44 = vmul.f32 0.25, %v146_v43 }
  0x36   :  { %v149_v45 = vcombine.high %v147_v44, %v147_v44  ;;  %v151_v46 = vpack.c.bf16 %v147_v44, %v147_v44 }
  0x38   :  { %v152_v47 = vpack.c.bf16 %v149_v45, %v149_v45 }
  0x3a   :  { %610 = vmatprep.mubr.msk.bf16.mxu0 %vm249_vm10, %v152_v47 }
  0x3b   :  { %286 = vmatmul.mubr.bf16.vlgmr.msra.gmra.mrb[0].mxu0 %v151_v46 }
  0xb1   :  { %v421_v11 = vpop.permute.xlu1 %420 }
 0x10e   :  { %v287_v2 = vpop.f32.mrb[0].mxu0 }
 0x10f   :  { %v293_v7 = vpack.c.bf16 %v287_v2, %v287_v2  ;;  %v289_v49 = vpop.f32.mrb[1].mxu0 }
 0x110   :  { %v290_v50 = vpop.f32.mrb[2].mxu0 }
 0x111   :  { %v291_v51 = vpop.f32.mrb[3].mxu0  ;;  %658 = vmatmul.mubr.bf16.vlgmr.msra.gmra.mrb[0].mxu1 %v293_v7 }
 0x112   :  { %663 = vmatprep.mubr.msk.f32.mxu1 %vm754_vm11, %v753_v4 }
 0x1e4   :  { %v392_v59 = vpop.f32.mrb[0].mxu1 }
 0x1e5   :  { %v659_v60 = vpop.f32.mrb[1].mxu1  ;;  %v398_v61 = vmul.f32 %v392_v59, %v392_v59 }
 0x1e6   :  { %v395_v62 = vpop.f32.mrb[2].mxu1 }
 0x1e7   :  { %v660_v63 = vpop.f32.mrb[3].mxu1  ;;  %v406_v0 = vsel %vm405_vm12, %v398_v61, 0.0  ;;  %v400_v1 = vsel %vm399_vm13, %v398_v61, 0.0 }
 0x1e8   :  { %407 = vadd.xlane.f32.xlu0 %v406_v0 }
 0x1ec   :  { %401 = vadd.xlane.f32.xlu0 %v400_v1 }
 0x275   :  { %v408_v3 = vpop.xlane.xlu0 %407 }
 0x276   :  { %700 = vrsqrt.f32 %v408_v3 }
 0x279   :  { %v402_v5 = vpop.xlane.xlu0 %401 }
 0x27a   :  { %702 = vrsqrt.f32 %v402_v5 }
 0x280   :  { %v701_v6 = vpop.eup %700 }
 0x281   :  { %v410_v8 = vmul.f32 %v701_v6, %v392_v59 }
 0x283   :  { %v425_v9 = vrot.slane %v410_v8, 2 }
 0x284   :  { %v703_v10 = vpop.eup %702 }
 0x285   :  { %662 = vmatpush3.xpose.msra.mxu1 %v425_v9  ;;  %v404_v12 = vmul.f32 %v703_v10, %v392_v59 }
 0x286   :  { %666 = vmatprep.subr.mxu1 %v753_v4 }
 0x287   :  { %v423_v13 = vmul.f32 %v421_v11, %v404_v12 }
 0x289   :  { %664 = vmatmul.mubr.f32.vlgmr.msra.gmra.mrb[4].mxu1 %v423_v13 }
 0x28a   :  { %667 = vmatpush3.xpose.msra.mxu1 %v423_v13  ;;  %668 = vmatprep.mubr.msk.f32.mxu1 %vm754_vm11, %v753_v4 }
 0x28d   :  { %669 = vmatmul.mubr.f32.vlgmr.msra.gmra.mrb[6].mxu1 %v425_v9 }
 0x35c   :  { %v493_v14 = vpop.f32.mrb[4].mxu1 }
 0x35d   :  { %v665_v15 = vpop.f32.mrb[5].mxu1  ;;  %498 = vst.msk [vmem:[#allocation4] sm:$0x3] %vm497_vm14, %v493_v14 }
 0x35e   :  { %715 = shalt.err (!%p712_p4)
}
 0x35f   :  { %s716_s15 = scalar_lea.hbm %s934_s4, 32 }
 0x360   :  { %p717_p5 = scmp.ne.s32.totalorder %s934_s4, %s716_s15  ;;  %p720_p6 = scmp.lt.u32.totalorder %s716_s15, %s934_s4 }
 0x362   :  { %p722_p7 = pnand %p720_p6, %p717_p5 }
 0x364   :  { %725 = shalt.err (!%p722_p7)
}
 0x365   :  { %579 = dma.vmem_to_hbm [thread:$0]  %s577_s2, 32, %s934_s4, [#allocation5]   ;;  %v565_v4 = vpop.f32.mrb[6].mxu1 }
 0x366   :  { %569 = vst.msk [vmem:[#allocation6] sm:$0x3] %vm497_vm14, %v565_v4  ;;  %v670_v16 = vpop.f32.mrb[7].mxu1  ;;  %s726_s22 = scalar_lea.vmem %s587_s11, 32  ;;  %p731_p9 = scmp.lt.s32.totalorder %s587_s11, %s587_s11 }
 0x367   :  { %p727_p8 = scmp.ne.s32.totalorder %s587_s11, %s726_s22  ;;  %p732_p10 = scmp.lt.s32.totalorder %s726_s22, %s726_s22 }
 0x369   :  { %p733_p11 = por %p732_p10, %p731_p9 }
 0x36b   :  { %p734_p12 = pnand %p733_p11, %p727_p8 }
 0x36d   :  { %737 = shalt.err (!%p734_p12)
}
 0x36e   :  { %s738_s24 = scalar_lea.hbm %s935_s5, 32 }
 0x36f   :  { %p739_p13 = scmp.ne.s32.totalorder %s935_s5, %s738_s24  ;;  %p742_p0 = scmp.lt.u32.totalorder %s738_s24, %s935_s5 }
 0x371   :  { %p744_p1 = pnand %p742_p0, %p739_p13 }
 0x373   :  { %747 = shalt.err (!%p744_p1)
}
 0x374   :  { %589 = dma.vmem_to_hbm [thread:$0]  %s587_s11, 32, %s935_s5, [#allocation7]  }
 0x375   :  { %748 = dma.done.wait [#allocation5], 32  }
 0x376   :  { %749 = vsyncadd [#allocation5], 4294967264 }
 0x377   :  { %750 = dma.done.wait [#allocation7], 32  }
 0x378   :  { %751 = vsyncadd [#allocation7], 4294967264 }
 0x379   :  { %596 = vsyncpa [#allocation5], 1 }
 0x37a   :  { %597 = vsyncpa [#allocation7], 1 }

</bundles_post_ra>
